<compile_context>
chip_gen: v5e
topology: v5e:2x2
jax: 0.10.0
libtpu: 0.0.40
codegen_flags: <defaults>
</compile_context>

<pallas_src>
import jax
import jax.numpy as jnp
from jax.experimental import pallas as pl
from jax.experimental.pallas import tpu as pltpu

ALPHA = 0.2            # LeakyReLU negative slope (module's `alpha`)
NEG_BIG = -1e12        # matches -1000000000000.0 in the PyTorch code. MUST stay finite:
                       # -inf would make the online-softmax correction exp(-inf - (-inf)) = NaN.
_LANE = 128
_H_RESIDENT_BUDGET = 16 * 1024 * 1024   # keep bf16 h fully VMEM-resident up to ~16 MiB


def _round_up(x, m):
    return ((x + m - 1) // m) * m


def _bf16_eup_ok():
    """bf16 exp only pays off on chips whose VPU/EUP have a bf16 path (v6e / v7x)."""
    try:
        kind = jax.devices()[0].device_kind.lower()
    except Exception:
        return False
    return ("v6" in kind) or ("v7" in kind)


# ---------------------------------------------------------------------------
# pass 1: h = linear1(inp); f_src = h @ a_left + b2; f_dst = h @ a_right
# ---------------------------------------------------------------------------
def _project_kernel(inp_ref, w1_ref, b1_ref, al_ref, ar_ref, b2_ref,
                    h_ref, fsrc_ref, fdst_ref):
    h32 = jnp.dot(inp_ref[...], w1_ref[...],
                  preferred_element_type=jnp.float32) + b1_ref[...]
    # a_left / a_right mat-vecs as VPU multiply + lane reduce (avoid lane-width-1 MXU output).
    fsrc_ref[...] = jnp.sum(h32 * al_ref[...], axis=-1, keepdims=True) + b2_ref[0, 0]
    fdst_ref[...] = jnp.sum(h32 * ar_ref[...], axis=-1, keepdims=True)
    # h stored in bf16: it is re-read (VMEM-resident or streamed) in pass 2.
    h_ref[...] = h32.astype(h_ref.dtype)


# ---------------------------------------------------------------------------
# pass 2: flash-style masked softmax + aggregation + ELU
# ---------------------------------------------------------------------------
def _make_attention_kernel(tile_j, resident_h, bf16_exp):
    def kernel(mask_ref, fsrc_ref, fdst_ref, hv_ref, out_ref, m_ref, l_ref, acc_ref):
        j = pl.program_id(1)

        @pl.when(j == 0)
        def _():
            m_ref[...] = jnp.full_like(m_ref, -jnp.inf)
            l_ref[...] = jnp.zeros_like(l_ref)
            acc_ref[...] = jnp.zeros_like(acc_ref)

        # pairwise logits for this (row-block, col-block) tile
        e = fsrc_ref[...] + fdst_ref[...]                 # (TI,1) + (1,TJ) -> (TI,TJ)
        e = jnp.maximum(e, ALPHA * e)                     # LeakyReLU, single VPU op
        e = jnp.where(mask_ref[...] > 0, e, NEG_BIG)      # adjacency mask (int8 0/1)

        # online softmax update (f32 running stats)
        m_prev = m_ref[...]
        m_new = jnp.maximum(m_prev, jnp.max(e, axis=1, keepdims=True))
        corr = jnp.exp(m_prev - m_new)

        if resident_h:
            start = pl.multiple_of(j * tile_j, tile_j)
            hv = hv_ref[pl.ds(start, tile_j), :]
        else:
            hv = hv_ref[...]

        if bf16_exp:
            # v6e/v7x: bf16 EUP halves transcendental cost; p is fed to the MXU in bf16 anyway.
            p = jnp.exp((e - m_new).astype(jnp.bfloat16))
            p_sum = jnp.sum(p.astype(jnp.float32), axis=1, keepdims=True)
        else:
            p = jnp.exp(e - m_new)
            p_sum = jnp.sum(p, axis=1, keepdims=True)

        l_ref[...] = corr * l_ref[...] + p_sum
        acc_ref[...] = corr * acc_ref[...] + jnp.dot(
            p.astype(hv.dtype), hv, preferred_element_type=jnp.float32)
        m_ref[...] = m_new

        @pl.when(j == pl.num_programs(1) - 1)
        def _():
            # exact reciprocal (once per row block, negligible cost) for tighter parity
            h_prime = acc_ref[...] * pl.reciprocal(l_ref[...], approx=False)
            # concat=True branch -> ELU; exp(min(x,0)) keeps the EUP argument range small.
            out_ref[...] = jnp.where(h_prime > 0.0, h_prime,
                                     jnp.exp(jnp.minimum(h_prime, 0.0)) - 1.0)

    return kernel


def graph_attention_layer(inp, adj, w1, b1, a_left, a_right, b2,
                          *, tile_i=None, tile_j=None, tile_proj=None):
    """GAT forward. inp (N,Fin), adj (N,N); w1 (Fin,Fout); b1 (1,Fout);
    a_left/a_right (Fout,1); b2 (1,1). Returns (N, Fout) float32."""
    N, f_in = inp.shape
    f_out = w1.shape[1]
    f_out_pad = _round_up(max(f_out, _LANE), _LANE)   # lane-dense feature slab

    # --- adaptive tile selection: tile_i | tile_j so one node padding serves rows and cols ---
    if tile_j is None:
        tile_j = min(512, _round_up(N, 256))          # column/stream tile, multiple of 256
    if tile_i is None:
        tile_i = min(256, tile_j)                     # row tile
    assert tile_j % tile_i == 0 and tile_i % 128 == 0 and tile_j % 128 == 0

    n_pad = _round_up(N, tile_j)
    if n_pad == tile_i and n_pad >= 256:
        tile_i = n_pad // 2                           # keep >=2 row blocks (v7x dual-TC)
    pad_n = n_pad - N

    if tile_proj is None:
        tile_proj = min(512, n_pad)                   # pass-1 row tile (bigger = fewer steps)

    # --- wrapper-side prep (padded, bf16 MXU operands, int8 mask) ---
    inp_bf = jnp.pad(inp, ((0, pad_n), (0, 0))).astype(jnp.bfloat16)
    adj01 = adj if adj.dtype == jnp.bool_ else (adj > 0)
    mask_p = jnp.pad(adj01.astype(jnp.int8), ((0, pad_n), (0, pad_n)))

    pad_f = f_out_pad - f_out
    w1_bf = jnp.pad(w1, ((0, 0), (0, pad_f))).astype(jnp.bfloat16)
    b1_row = jnp.pad(b1.reshape(1, f_out), ((0, 0), (0, pad_f))).astype(jnp.float32)
    al_row = jnp.pad(a_left.reshape(1, f_out), ((0, 0), (0, pad_f))).astype(jnp.float32)
    ar_row = jnp.pad(a_right.reshape(1, f_out), ((0, 0), (0, pad_f))).astype(jnp.float32)
    b2_s = b2.reshape(1, 1).astype(jnp.float32)

    # ---- pass 1: projection (h, f_src, f_dst) ----
    h_bf, f_src, f_dst = pl.pallas_call(
        _project_kernel,
        out_shape=(jax.ShapeDtypeStruct((n_pad, f_out_pad), jnp.bfloat16),
                   jax.ShapeDtypeStruct((n_pad, 1), jnp.float32),
                   jax.ShapeDtypeStruct((n_pad, 1), jnp.float32)),
        grid_spec=pltpu.PrefetchScalarGridSpec(
            num_scalar_prefetch=0,
            grid=(n_pad // tile_proj,),
            in_specs=[
                pl.BlockSpec((tile_proj, f_in), lambda i: (i, 0)),
                pl.BlockSpec((f_in, f_out_pad), lambda i: (0, 0)),
                pl.BlockSpec((1, f_out_pad), lambda i: (0, 0)),
                pl.BlockSpec((1, f_out_pad), lambda i: (0, 0)),
                pl.BlockSpec((1, f_out_pad), lambda i: (0, 0)),
                pl.BlockSpec(memory_space=pltpu.MemorySpace.SMEM),   # b2 scalar
            ],
            out_specs=[
                pl.BlockSpec((tile_proj, f_out_pad), lambda i: (i, 0)),
                pl.BlockSpec((tile_proj, 1), lambda i: (i, 0)),
                pl.BlockSpec((tile_proj, 1), lambda i: (i, 0)),
            ]),
        compiler_params=pltpu.CompilerParams(
            dimension_semantics=("parallel",)),
    )(inp_bf, w1_bf, b1_row, al_row, ar_row, b2_s)

    # lane-major view of f_dst so column tiles slice along lanes
    f_dst_row = f_dst.reshape(1, n_pad)

    # ---- pass 2: flash-style masked softmax + aggregation ----
    h_bytes = n_pad * f_out_pad * 2
    resident_h = h_bytes <= _H_RESIDENT_BUDGET
    bf16_exp = _bf16_eup_ok()

    if resident_h:
        hv_spec = pl.BlockSpec((n_pad, f_out_pad), lambda i, j: (0, 0))   # single DMA, stays in VMEM
        hv_vmem = h_bytes
    else:
        hv_spec = pl.BlockSpec((tile_j, f_out_pad), lambda i, j: (j, 0))  # streamed per column block
        hv_vmem = 2 * tile_j * f_out_pad * 2

    vmem_need = (hv_vmem
                 + 2 * tile_i * tile_j            # int8 mask double buffer
                 + 2 * tile_i * f_out_pad * 4     # output double buffer
                 + tile_i * f_out_pad * 4         # acc scratch
                 + 8 * (tile_i + tile_j) * 4)     # f_src/f_dst buffers + m/l scratch (generous)
    vmem_limit = int(min(max(vmem_need + (8 << 20), 32 << 20), 48 << 20))

    out_p = pl.pallas_call(
        _make_attention_kernel(tile_j, resident_h, bf16_exp),
        out_shape=jax.ShapeDtypeStruct((n_pad, f_out_pad), jnp.float32),
        grid_spec=pltpu.PrefetchScalarGridSpec(
            num_scalar_prefetch=0,
            grid=(n_pad // tile_i, n_pad // tile_j),
            in_specs=[
                pl.BlockSpec((tile_i, tile_j), lambda i, j: (i, j)),   # adjacency mask (int8)
                pl.BlockSpec((tile_i, 1), lambda i, j: (i, 0)),        # f_src rows
                pl.BlockSpec((1, tile_j), lambda i, j: (0, j)),        # f_dst cols
                hv_spec,                                               # h for aggregation (bf16)
            ],
            out_specs=pl.BlockSpec((tile_i, f_out_pad), lambda i, j: (i, 0)),
            scratch_shapes=[
                pltpu.VMEM((tile_i, 1), jnp.float32),          # running max
                pltpu.VMEM((tile_i, 1), jnp.float32),          # running sum
                pltpu.VMEM((tile_i, f_out_pad), jnp.float32),  # output accumulator
            ]),
        compiler_params=pltpu.CompilerParams(
            dimension_semantics=("parallel", "arbitrary"),
            vmem_limit_bytes=vmem_limit),
    )(mask_p, f_src, f_dst_row, h_bf)

    return out_p[:N, :f_out]


def init_params(key, in_features, out_features):
    """Deterministic synthetic init mirroring c2_xavier_fill shapes (bias -> 0)."""
    k1, k2 = jax.random.split(key, 2)
    bound1 = (6.0 / in_features) ** 0.5
    w1 = jax.random.uniform(k1, (in_features, out_features),
                            minval=-bound1, maxval=bound1, dtype=jnp.float32)
    b1 = jnp.zeros((1, out_features), jnp.float32)
    bound2 = (6.0 / (2 * out_features)) ** 0.5
    a_full = jax.random.uniform(k2, (2 * out_features, 1),
                                minval=-bound2, maxval=bound2, dtype=jnp.float32)
    a_left = a_full[:out_features, :]
    a_right = a_full[out_features:, :]
    b2 = jnp.zeros((1, 1), jnp.float32)
    return w1, b1, a_left, a_right, b2


if __name__ == "__main__":
    key = jax.random.PRNGKey(0)
    k_inp, k_adj, k_par = jax.random.split(key, 3)

    N = 200               # not a tile multiple on purpose (exercises padding path)
    in_features = 64
    out_features = 32

    inp = jax.random.normal(k_inp, (N, in_features), dtype=jnp.float32)
    # random 0/1 adjacency with self-loops so every row has at least one neighbor
    adj = (jax.random.uniform(k_adj, (N, N)) > 0.5).astype(jnp.float32)
    adj = jnp.maximum(adj, jnp.eye(N, dtype=jnp.float32))

    w1, b1, a_left, a_right, b2 = init_params(k_par, in_features, out_features)

    out = graph_attention_layer(inp, adj, w1, b1, a_left, a_right, b2)
    jax.block_until_ready(out)

    # pure-JAX f32 reference of the same math
    h = inp @ w1 + b1
    e = h @ a_left + (h @ a_right).T + b2
    e = jnp.where(e > 0, e, ALPHA * e)
    att = jnp.where(adj > 0, e, NEG_BIG)
    att = jax.nn.softmax(att, axis=1)
    ref = jax.nn.elu(att @ h)

    assert out.shape == ref.shape
    # bf16 MXU operands (+ bf16 exp on v6e/v7x) -> loose but still bug-catching tolerance
    assert jnp.allclose(out, ref, atol=5e-2, rtol=5e-2), float(jnp.max(jnp.abs(out - ref)))

    print("KERNEL_OK")
</pallas_src>

<mosaic_0001>
module attributes {stable_mosaic.version = 11 : i64} {
  func.func @_project_kernel(%arg0: i32, %arg1: memref<256x64xbf16, #tpu.memory_space<vmem>>, %arg2: memref<64x128xbf16, #tpu.memory_space<vmem>>, %arg3: memref<1x128xf32, #tpu.memory_space<vmem>>, %arg4: memref<1x128xf32, #tpu.memory_space<vmem>>, %arg5: memref<1x128xf32, #tpu.memory_space<vmem>>, %arg6: memref<1x1xf32, #tpu.memory_space<smem>>, %arg7: memref<256x128xbf16, #tpu.memory_space<vmem>>, %arg8: memref<256x1xf32, #tpu.memory_space<vmem>>, %arg9: memref<256x1xf32, #tpu.memory_space<vmem>>) attributes {dimension_semantics = [#tpu.dimension_semantics<parallel>], iteration_bounds = array<i64: 1>, scalar_prefetch = 0 : i64, scratch_operands = 0 : i64, tpu.core_type = #tpu.core_type<tc>, window_params = [{transform_indices = @transform_0, window_bounds = array<i64: 256, 64>}, {pipeline_mode = #tpu.pipeline_mode<synchronous>, transform_indices = @transform_1, window_bounds = array<i64: 64, 128>}, {pipeline_mode = #tpu.pipeline_mode<synchronous>, transform_indices = @transform_2, window_bounds = array<i64: 1, 128>}, {pipeline_mode = #tpu.pipeline_mode<synchronous>, transform_indices = @transform_3, window_bounds = array<i64: 1, 128>}, {pipeline_mode = #tpu.pipeline_mode<synchronous>, transform_indices = @transform_4, window_bounds = array<i64: 1, 128>}, {transform_indices = @transform_5, window_bounds = array<i64: 1, 1>}, {transform_indices = @transform_6, window_bounds = array<i64: 256, 128>}, {transform_indices = @transform_7, window_bounds = array<i64: 256, 1>}, {transform_indices = @transform_8, window_bounds = array<i64: 256, 1>}]} {
    %c0 = arith.constant 0 : index
    %c0_0 = arith.constant 0 : index
    %0 = vector.load %arg1[%c0, %c0_0] : memref<256x64xbf16, #tpu.memory_space<vmem>>, vector<256x64xbf16>
    %c0_1 = arith.constant 0 : index
    %c0_2 = arith.constant 0 : index
    %1 = vector.load %arg2[%c0_1, %c0_2] : memref<64x128xbf16, #tpu.memory_space<vmem>>, vector<64x128xbf16>
    %cst = arith.constant dense<0.000000e+00> : vector<256x128xf32>
    %2 = tpu.matmul %0, %1, %cst {dimension_numbers = #tpu.dot_dimension_numbers<[1], [0], [0], [1], [0, 0, 1, 1], [], []>} : vector<256x64xbf16>, vector<64x128xbf16>, vector<256x128xf32> -> vector<256x128xf32>
    %c0_3 = arith.constant 0 : index
    %c0_4 = arith.constant 0 : index
    %3 = vector.load %arg3[%c0_3, %c0_4] : memref<1x128xf32, #tpu.memory_space<vmem>>, vector<1x128xf32>
    %4 = vector.broadcast %3 : vector<1x128xf32> to vector<256x128xf32>
    %5 = arith.addf %2, %4 : vector<256x128xf32>
    %c0_5 = arith.constant 0 : index
    %c0_6 = arith.constant 0 : index
    %6 = vector.load %arg4[%c0_5, %c0_6] : memref<1x128xf32, #tpu.memory_space<vmem>>, vector<1x128xf32>
    %7 = vector.broadcast %6 : vector<1x128xf32> to vector<256x128xf32>
    %8 = arith.mulf %5, %7 : vector<256x128xf32>
    %cst_7 = arith.constant dense<0.000000e+00> : vector<256xf32>
    %9 = vector.multi_reduction <add>, %8, %cst_7 [1] : vector<256x128xf32> to vector<256xf32>
    %10 = vector.shape_cast %9 : vector<256xf32> to vector<256x1xf32>
    %c0_8 = arith.constant 0 : index
    %c0_9 = arith.constant 0 : index
    %11 = memref.load %arg6[%c0_8, %c0_9] : memref<1x1xf32, #tpu.memory_space<smem>>
    %12 = vector.broadcast %11 : f32 to vector<256x1xf32>
    %13 = arith.addf %10, %12 : vector<256x1xf32>
    %c0_10 = arith.constant 0 : index
    %c0_11 = arith.constant 0 : index
    %14 = vector.load %arg8[%c0_10, %c0_11] : memref<256x1xf32, #tpu.memory_space<vmem>>, vector<256x1xf32>
    tpu.vector_store %arg8[%c0_10, %c0_11], %13 {strides = array<i32>} : memref<256x1xf32, #tpu.memory_space<vmem>>, vector<256x1xf32>,
    %c0_12 = arith.constant 0 : index
    %c0_13 = arith.constant 0 : index
    %15 = vector.load %arg5[%c0_12, %c0_13] : memref<1x128xf32, #tpu.memory_space<vmem>>, vector<1x128xf32>
    %16 = vector.broadcast %15 : vector<1x128xf32> to vector<256x128xf32>
    %17 = arith.mulf %5, %16 : vector<256x128xf32>
    %cst_14 = arith.constant dense<0.000000e+00> : vector<256xf32>
    %18 = vector.multi_reduction <add>, %17, %cst_14 [1] : vector<256x128xf32> to vector<256xf32>
    %19 = vector.shape_cast %18 : vector<256xf32> to vector<256x1xf32>
    %c0_15 = arith.constant 0 : index
    %c0_16 = arith.constant 0 : index
    %20 = vector.load %arg9[%c0_15, %c0_16] : memref<256x1xf32, #tpu.memory_space<vmem>>, vector<256x1xf32>
    tpu.vector_store %arg9[%c0_15, %c0_16], %19 {strides = array<i32>} : memref<256x1xf32, #tpu.memory_space<vmem>>, vector<256x1xf32>,
    %21 = arith.truncf %5 : vector<256x128xf32> to vector<256x128xbf16>
    %c0_17 = arith.constant 0 : index
    %c0_18 = arith.constant 0 : index
    %22 = vector.load %arg7[%c0_17, %c0_18] : memref<256x128xbf16, #tpu.memory_space<vmem>>, vector<256x128xbf16>
    tpu.vector_store %arg7[%c0_17, %c0_18], %21 {strides = array<i32>} : memref<256x128xbf16, #tpu.memory_space<vmem>>, vector<256x128xbf16>,
    return
  }
  func.func @transform_0(%arg0: i32) -> (i32, i32) {
    %c0_i32 = arith.constant 0 : i32
    %c0_i32_0 = arith.constant 0 : i32
    return %arg0, %c0_i32 : i32, i32
  }
  func.func @transform_1(%arg0: i32) -> (i32, i32) {
    %c0_i32 = arith.constant 0 : i32
    %c0_i32_0 = arith.constant 0 : i32
    %c0_i32_1 = arith.constant 0 : i32
    return %c0_i32, %c0_i32_0 : i32, i32
  }
  func.func @transform_2(%arg0: i32) -> (i32, i32) {
    %c0_i32 = arith.constant 0 : i32
    %c0_i32_0 = arith.constant 0 : i32
    %c0_i32_1 = arith.constant 0 : i32
    return %c0_i32, %c0_i32_0 : i32, i32
  }
  func.func @transform_3(%arg0: i32) -> (i32, i32) {
    %c0_i32 = arith.constant 0 : i32
    %c0_i32_0 = arith.constant 0 : i32
    %c0_i32_1 = arith.constant 0 : i32
    return %c0_i32, %c0_i32_0 : i32, i32
  }
  func.func @transform_4(%arg0: i32) -> (i32, i32) {
    %c0_i32 = arith.constant 0 : i32
    %c0_i32_0 = arith.constant 0 : i32
    %c0_i32_1 = arith.constant 0 : i32
    return %c0_i32, %c0_i32_0 : i32, i32
  }
  func.func @transform_5(%arg0: i32) -> (i32, i32) {
    %c0_i32 = arith.constant 0 : i32
    %c0_i32_0 = arith.constant 0 : i32
    %c0_i32_1 = arith.constant 0 : i32
    return %c0_i32, %c0_i32_0 : i32, i32
  }
  func.func @transform_6(%arg0: i32) -> (i32, i32) {
    %c0_i32 = arith.constant 0 : i32
    %c0_i32_0 = arith.constant 0 : i32
    return %arg0, %c0_i32 : i32, i32
  }
  func.func @transform_7(%arg0: i32) -> (i32, i32) {
    %c0_i32 = arith.constant 0 : i32
    %c0_i32_0 = arith.constant 0 : i32
    return %arg0, %c0_i32 : i32, i32
  }
  func.func @transform_8(%arg0: i32) -> (i32, i32) {
    %c0_i32 = arith.constant 0 : i32
    %c0_i32_0 = arith.constant 0 : i32
    return %arg0, %c0_i32 : i32, i32
  }
}

</mosaic_0001>

<bundles_post_ra>
// kernel: tpu_custom_call.1
= control target key start
LH: loop header
LB: loop body
LE: loop exit
PB: predicated region body
PF: predicated region fallthrough
CT: control target
= control target key end

     0   :  { %s1570_s0 = inlined_call_operand.vmem [shape: bf16[256,64], index: 0, kind: input, shape index: {}]   ;;  %s1571_s1 = inlined_call_operand.vmem [shape: bf16[64,128], index: 1, kind: input, shape index: {}]   ;;  %s1572_s2 = inlined_call_operand.vmem [shape: f32[1,128], index: 2, kind: input, shape index: {}]   ;;  %s1573_s3 = inlined_call_operand.vmem [shape: f32[1,128], index: 3, kind: input, shape index: {}]   ;;  %s1574_s4 = inlined_call_operand.vmem [shape: f32[1,128], index: 4, kind: input, shape index: {}]   ;;  %s1575_s5 = inlined_call_operand.<no memory space> [shape: f32[1,1], index: 5, kind: input, shape index: {}]   ;;  %s1576_s6 = inlined_call_operand.hbm [shape: bf16[256,128], index: 6, kind: output, shape index: {0}]   ;;  %s1577_s7 = inlined_call_operand.vmem [shape: f32[256,1], index: 7, kind: output, shape index: {1}]   ;;  %s1578_s8 = inlined_call_operand.vmem [shape: f32[256,1], index: 8, kind: output, shape index: {2}]  }
   0x1   :  { %v819_v0 = vld [vmem:[%s1571_s1 + $0x18] sm:$0xff]  ;;  %v818_v1 = vld [vmem:[%s1571_s1 + $0x10] sm:$0xff] }
   0x2   :  { %230 = vmatpush.bf16.msra.mxu0 %v819_v0  ;;  %915 = vmatpush.bf16.msra.mxu1 %v819_v0 }
   0x3   :  { %917 = vmatpush.bf16.msra.mxu3 %v819_v0  ;;  %916 = vmatpush.bf16.msra.mxu2 %v819_v0 }
   0x4   :  { %15 = vsyncpa [#allocation4], 0  ;;  %v817_v2 = vld [vmem:[%s1571_s1 + $0x8] sm:$0xff]  ;;  %v816_v3 = vld [vmem:[%s1571_s1] sm:$0xff]  ;;  %vm177_vm0 = vcmask 523264   ;;  %vm449_vm1 = vcmask 7168  }
   0x5   :  { %v800_v4 = vld [vmem:[%s1570_s0] sm:$0xff]  ;;  %v801_v8 = vld [vmem:[%s1570_s0 + $0x8] sm:$0xff]  ;;  %v802_v12 = vld [vmem:[%s1570_s0 + $0x10] sm:$0xff]  ;;  %s684_s10 = sshll.u32 %s1576_s6, 4  ;;  %s960_s6 = smov 64   ;;  %s685_s10 = int_to_ptr.hbm [resolvable:$true] %s684_s10 }
   0x6   :  { %231 = vmatpush.bf16.msra.mxu0 %v818_v1  ;;  %918 = vmatpush.bf16.msra.mxu1 %v818_v1  ;;  %v804_v5 = vld [vmem:[%s1570_s0 + $0x20] sm:$0xff]  ;;  %v805_v9 = vld [vmem:[%s1570_s0 + $0x28] sm:$0xff]  ;;  %v806_v13 = vld [vmem:[%s1570_s0 + $0x30] sm:$0xff]  ;;  %s961_s15 = smov 4  }
   0x7   :  { %920 = vmatpush.bf16.msra.mxu3 %v818_v1  ;;  %919 = vmatpush.bf16.msra.mxu2 %v818_v1  ;;  %v812_v6 = vld [vmem:[%s1570_s0 + $0x60] sm:$0xff]  ;;  %v813_v10 = vld [vmem:[%s1570_s0 + $0x68] sm:$0xff]  ;;  %v814_v14 = vld [vmem:[%s1570_s0 + $0x70] sm:$0xff] }
   0x8   :  { %v808_v7 = vld [vmem:[%s1570_s0 + $0x40] sm:$0xff]  ;;  %v809_v11 = vld [vmem:[%s1570_s0 + $0x48] sm:$0xff]  ;;  %v810_v15 = vld [vmem:[%s1570_s0 + $0x50] sm:$0xff] }
   0x9   :  { %v803_v16 = vld [vmem:[%s1570_s0 + $0x18] sm:$0xff]  ;;  %v1086_v20 = vld [vmem:[%s1572_s2] ss:$0 sm:$0xff] }
   0xa   :  { %232 = vmatpush.bf16.msra.mxu0 %v817_v2  ;;  %921 = vmatpush.bf16.msra.mxu1 %v817_v2  ;;  %v807_v17 = vld [vmem:[%s1570_s0 + $0x38] sm:$0xff]  ;;  %v1091_v21 = vld [vmem:[%s1574_s4] ss:$0 sm:$0xff] }
   0xb   :  { %923 = vmatpush.bf16.msra.mxu3 %v817_v2  ;;  %922 = vmatpush.bf16.msra.mxu2 %v817_v2  ;;  %v811_v18 = vld [vmem:[%s1570_s0 + $0x58] sm:$0xff]  ;;  %v1096_v22 = vld [vmem:[%s1573_s3] ss:$0 sm:$0xff] }
   0xc   :  { %v815_v19 = vld [vmem:[%s1570_s0 + $0x78] sm:$0xff] }
   0xe   :  { %233 = vmatpush.bf16.msra.mxu0 %v816_v3  ;;  %924 = vmatpush.bf16.msra.mxu1 %v816_v3 }
   0xf   :  { %926 = vmatpush.bf16.msra.mxu3 %v816_v3  ;;  %925 = vmatpush.bf16.msra.mxu2 %v816_v3 }
  0x11   :  { %784 = vmatmul.msk.bf16.vlgmr.msra.gmra.mxu0 %vm177_vm0, %v800_v4  ;;  %788 = vmatmul.msk.bf16.vlgmr.msra.gmra.mxu1 %vm177_vm0, %v804_v5 }
  0x12   :  { %796 = vmatmul.msk.bf16.vlgmr.msra.gmra.mxu3 %vm177_vm0, %v812_v6  ;;  %792 = vmatmul.msk.bf16.vlgmr.msra.gmra.mxu2 %vm177_vm0, %v808_v7 }
  0x21   :  { %785 = vmatmul.msk.bf16.gmra.mxu0 %vm177_vm0, %v801_v8  ;;  %789 = vmatmul.msk.bf16.gmra.mxu1 %vm177_vm0, %v805_v9 }
  0x22   :  { %797 = vmatmul.msk.bf16.gmra.mxu3 %vm177_vm0, %v813_v10  ;;  %793 = vmatmul.msk.bf16.gmra.mxu2 %vm177_vm0, %v809_v11 }
  0x31   :  { %786 = vmatmul.msk.bf16.gmra.mxu0 %vm177_vm0, %v802_v12  ;;  %790 = vmatmul.msk.bf16.gmra.mxu1 %vm177_vm0, %v806_v13 }
  0x32   :  { %798 = vmatmul.msk.bf16.gmra.mxu3 %vm177_vm0, %v814_v14  ;;  %794 = vmatmul.msk.bf16.gmra.mxu2 %vm177_vm0, %v810_v15 }
  0x41   :  { %787 = vmatmul.msk.bf16.gmra.mxu0 %vm177_vm0, %v803_v16  ;;  %791 = vmatmul.msk.bf16.gmra.mxu1 %vm177_vm0, %v807_v17 }
  0x42   :  { %795 = vmatmul.msk.bf16.gmra.mxu2 %vm177_vm0, %v811_v18  ;;  %799 = vmatmul.msk.bf16.gmra.mxu3 %vm177_vm0, %v815_v19 }
  0x8e   :  { %v235_v23 = vpop.f32.mrf.mxu0  ;;  %v255_v24 = vpop.f32.mrf.mxu1 }
  0x8f   :  { %v236_v25 = vadd.f32 %v1086_v20, %v235_v23  ;;  %v256_v26 = vadd.f32 %v1086_v20, %v255_v24 }
  0x91   :  { %v494_v27 = vmul.f32 %v1091_v21, %v256_v26  ;;  %v327_v28 = vmul.f32 %v1096_v22, %v256_v26  ;;  %v319_v29 = vmul.f32 %v1096_v22, %v236_v25  ;;  %v486_v42 = vmul.f32 %v1091_v21, %v236_v25 }
  0x93   :  { %534 = vadd.xlane.f32.xlu1 %v494_v27  ;;  %367 = vadd.xlane.f32.xlu2 %v327_v28 }
  0x94   :  { %351 = vadd.xlane.f32.xlu0 %v319_v29 }
  0x95   :  { %v295_v30 = vpop.f32.mrf.mxu3  ;;  %v275_v31 = vpop.f32.mrf.mxu2 }
  0x96   :  { %v296_v32 = vadd.f32 %v1086_v20, %v295_v30  ;;  %v237_v33 = vpop.f32.mrf.mxu0  ;;  %v257_v34 = vpop.f32.mrf.mxu1  ;;  %v276_v35 = vadd.f32 %v1086_v20, %v275_v31 }
  0x97   :  { %v1106_v36 = vadd.f32 %v1086_v20, %v237_v33  ;;  %v258_v37 = vadd.f32 %v1086_v20, %v257_v34 }
  0x98   :  { %v335_v38 = vmul.f32 %v1096_v22, %v276_v35  ;;  %v343_v39 = vmul.f32 %v1096_v22, %v296_v32  ;;  %v502_v51 = vmul.f32 %v1091_v21, %v276_v35  ;;  %v510_v53 = vmul.f32 %v1091_v21, %v296_v32 }
  0x99   :  { %v823_v40 = vpack.c.bf16 %v1106_v36, %v236_v25  ;;  %v843_v41 = vpack.c.bf16 %v258_v37, %v256_v26  ;;  %v495_v63 = vmul.f32 %v1091_v21, %v258_v37  ;;  %v320_v2 = vmul.f32 %v1096_v22, %v1106_v36 }
  0x9a   :  { %v328_v13 = vmul.f32 %v1096_v22, %v258_v37  ;;  %v487_v16 = vmul.f32 %v1091_v21, %v1106_v36 }
  0x9b   :  { %824 = vst [vmem:[#allocation3] sm:$0xff] %v823_v40   ;;  %383 = vadd.xlane.f32.xlu1 %v335_v38  ;;  %518 = vadd.xlane.f32.xlu2 %v486_v42 }
  0x9c   :  { %903 = vst [vmem:[#allocation3 + $0x20] sm:$0xff] %v843_v41   ;;  %399 = vadd.xlane.f32.xlu0 %v343_v39 }
  0x9d   :  { %v297_v43 = vpop.f32.mrf.mxu3  ;;  %v277_v44 = vpop.f32.mrf.mxu2 }
  0x9e   :  { %v298_v45 = vadd.f32 %v1086_v20, %v297_v43  ;;  %v278_v46 = vadd.f32 %v1086_v20, %v277_v44  ;;  %v240_v47 = vpop.f32.mrf.mxu0  ;;  %v260_v48 = vpop.f32.mrf.mxu1 }
  0x9f   :  { %v241_v58 = vadd.f32 %v1086_v20, %v240_v47  ;;  %v261_v60 = vadd.f32 %v1086_v20, %v260_v48 }
  0xa0   :  { %v883_v49 = vpack.c.bf16 %v298_v45, %v296_v32  ;;  %v863_v50 = vpack.c.bf16 %v278_v46, %v276_v35  ;;  %v344_v52 = vmul.f32 %v1096_v22, %v298_v45  ;;  %v503_v62 = vmul.f32 %v1091_v21, %v278_v46 }
  0xa1   :  { %v321_v9 = vmul.f32 %v1096_v22, %v241_v58  ;;  %v336_v12 = vmul.f32 %v1096_v22, %v278_v46  ;;  %v329_v14 = vmul.f32 %v1096_v22, %v261_v60  ;;  %v488_v23 = vmul.f32 %v1091_v21, %v241_v58 }
  0xa2   :  { %911 = vst [vmem:[#allocation3 + $0x60] sm:$0xff] %v883_v49   ;;  %v511_v24 = vmul.f32 %v1091_v21, %v298_v45  ;;  %v496_v36 = vmul.f32 %v1091_v21, %v261_v60 }
  0xa3   :  { %907 = vst [vmem:[#allocation3 + $0x40] sm:$0xff] %v863_v50   ;;  %401 = vadd.xlane.f32.xlu1 %v344_v52  ;;  %566 = vadd.xlane.f32.xlu2 %v510_v53 }
  0xa4   :  { %550 = vadd.xlane.f32.xlu0 %v502_v51 }
  0xa5   :  { %v300_v54 = vpop.f32.mrf.mxu3  ;;  %v280_v55 = vpop.f32.mrf.mxu2 }
  0xa6   :  { %v242_v56 = vpop.f32.mrf.mxu0  ;;  %v262_v57 = vpop.f32.mrf.mxu1  ;;  %v301_v5 = vadd.f32 %v1086_v20, %v300_v54  ;;  %v281_v6 = vadd.f32 %v1086_v20, %v280_v55 }
  0xa7   :  { %v1120_v59 = vadd.f32 %v1086_v20, %v242_v56  ;;  %v1124_v61 = vadd.f32 %v1086_v20, %v262_v57 }
  0xa8   :  { %v345_v15 = vmul.f32 %v1096_v22, %v301_v5  ;;  %v504_v19 = vmul.f32 %v1091_v21, %v281_v6  ;;  %v512_v34 = vmul.f32 %v1091_v21, %v301_v5  ;;  %v337_v44 = vmul.f32 %v1096_v22, %v281_v6 }
  0xa9   :  { %v828_v0 = vpack.c.bf16 %v1120_v59, %v241_v58  ;;  %v848_v1 = vpack.c.bf16 %v1124_v61, %v261_v60  ;;  %v330_v35 = vmul.f32 %v1096_v22, %v1124_v61  ;;  %v322_v42 = vmul.f32 %v1096_v22, %v1120_v59 }
  0xaa   :  { %v489_v43 = vmul.f32 %v1091_v21, %v1120_v59  ;;  %v497_v49 = vmul.f32 %v1091_v21, %v1124_v61 }
  0xab   :  { %552 = vadd.xlane.f32.xlu1 %v503_v62  ;;  %536 = vadd.xlane.f32.xlu2 %v495_v63  ;;  %900 = vst [vmem:[#allocation3 + $0x8] sm:$0xff] %v828_v0  }
  0xac   :  { %353 = vadd.xlane.f32.xlu0 %v320_v2  ;;  %904 = vst [vmem:[#allocation3 + $0x28] sm:$0xff] %v848_v1  }
  0xad   :  { %v302_v3 = vpop.f32.mrf.mxu3  ;;  %v282_v4 = vpop.f32.mrf.mxu2 }
  0xae   :  { %v303_v7 = vadd.f32 %v1086_v20, %v302_v3  ;;  %v1136_v8 = vadd.f32 %v1086_v20, %v282_v4  ;;  %v245_v17 = vpop.f32.mrf.mxu0  ;;  %v265_v18 = vpop.f32.mrf.mxu1 }
  0xaf   :  { %v266_v25 = vadd.f32 %v1086_v20, %v265_v18  ;;  %v246_v28 = vadd.f32 %v1086_v20, %v245_v17 }
  0xb0   :  { %v888_v10 = vpack.c.bf16 %v303_v7, %v301_v5  ;;  %v868_v11 = vpack.c.bf16 %v1136_v8, %v281_v6  ;;  %v513_v50 = vmul.f32 %v1091_v21, %v303_v7  ;;  %v346_v51 = vmul.f32 %v1096_v22, %v303_v7 }
  0xb1   :  { %v323_v52 = vmul.f32 %v1096_v22, %v246_v28  ;;  %v338_v53 = vmul.f32 %v1096_v22, %v1136_v8  ;;  %v505_v54 = vmul.f32 %v1091_v21, %v1136_v8  ;;  %v498_v57 = vmul.f32 %v1091_v21, %v266_v25 }
  0xb2   :  { %912 = vst [vmem:[#allocation3 + $0x68] sm:$0xff] %v888_v10   ;;  %v331_v58 = vmul.f32 %v1096_v22, %v266_v25  ;;  %v490_v6 = vmul.f32 %v1091_v21, %v246_v28 }
  0xb3   :  { %355 = vadd.xlane.f32.xlu1 %v321_v9  ;;  %385 = vadd.xlane.f32.xlu2 %v336_v12  ;;  %908 = vst [vmem:[#allocation3 + $0x48] sm:$0xff] %v868_v11  }
  0xb4   :  { %369 = vadd.xlane.f32.xlu0 %v328_v13 }
  0xb5   :  { %v305_v31 = vpop.f32.mrf.mxu3  ;;  %v285_v37 = vpop.f32.mrf.mxu2 }
  0xb6   :  { %v247_v26 = vpop.f32.mrf.mxu0  ;;  %v267_v27 = vpop.f32.mrf.mxu1  ;;  %v1164_v39 = vadd.f32 %v1086_v20, %v305_v31  ;;  %v286_v46 = vadd.f32 %v1086_v20, %v285_v37 }
  0xb7   :  { %v1152_v29 = vadd.f32 %v1086_v20, %v247_v26  ;;  %v1155_v30 = vadd.f32 %v1086_v20, %v267_v27 }
  0xb8   :  { %v347_v56 = vmul.f32 %v1096_v22, %v1164_v39  ;;  %v506_v1 = vmul.f32 %v1091_v21, %v286_v46  ;;  %v339_v2 = vmul.f32 %v1096_v22, %v286_v46 }
  0xb9   :  { %v833_v32 = vpack.c.bf16 %v1152_v29, %v246_v28  ;;  %v853_v33 = vpack.c.bf16 %v1155_v30, %v266_v25  ;;  %v332_v17 = vmul.f32 %v1096_v22, %v1155_v30  ;;  %v324_v18 = vmul.f32 %v1096_v22, %v1152_v29 }
  0xba   :  { %v1241_v25 = vstv %s1575_s5  ;;  %s959_s5 = smov [#allocation3]  }
  0xbb   :  { %371 = vadd.xlane.f32.xlu1 %v329_v14  ;;  %403 = vadd.xlane.f32.xlu2 %v345_v15  ;;  %901 = vst [vmem:[#allocation3 + $0x10] sm:$0xff] %v833_v32   ;;  %s682_s29 = sshll.u32 %s959_s5, 4  ;;  %s683_s29 = int_to_ptr.vmem [resolvable:$true] %s682_s29 }
  0xbc   :  { %520 = vadd.xlane.f32.xlu0 %v487_v16  ;;  %905 = vst [vmem:[#allocation3 + $0x30] sm:$0xff] %v853_v33  }
  0xbd   :  { %v307_v38 = vpop.f32.mrf.mxu3  ;;  %v287_v45 = vpop.f32.mrf.mxu2 }
  0xbe   :  { %v1167_v40 = vadd.f32 %v1086_v20, %v307_v38  ;;  %v1178_v47 = vadd.f32 %v1086_v20, %v287_v45  ;;  %v270_v55 = vpop.f32.mrf.mxu1  ;;  %v250_v59 = vpop.f32.mrf.mxu0 }
  0xbf   :  { %v271_v62 = vadd.f32 %v1086_v20, %v270_v55  ;;  %v1202_v4 = vadd.f32 %v1086_v20, %v250_v59 }
  0xc0   :  { %v893_v41 = vpack.c.bf16 %v1167_v40, %v1164_v39  ;;  %v873_v48 = vpack.c.bf16 %v1178_v47, %v286_v46  ;;  %v507_v32 = vmul.f32 %v1091_v21, %v1178_v47  ;;  %v340_v33 = vmul.f32 %v1096_v22, %v1178_v47 }
  0xc2   :  { %913 = vst [vmem:[#allocation3 + $0x70] sm:$0xff] %v893_v41  }
  0xc3   :  { %522 = vadd.xlane.f32.xlu1 %v488_v23  ;;  %554 = vadd.xlane.f32.xlu2 %v504_v19  ;;  %909 = vst [vmem:[#allocation3 + $0x50] sm:$0xff] %v873_v48   ;;  %v514_v19 = vmul.f32 %v1091_v21, %v1164_v39  ;;  %v348_v23 = vmul.f32 %v1096_v22, %v1167_v40 }
  0xc4   :  { %568 = vadd.xlane.f32.xlu0 %v511_v24  ;;  %v499_v24 = vmul.f32 %v1091_v21, %v1155_v30  ;;  %v500_v30 = vmul.f32 %v1091_v21, %v271_v62  ;;  %v333_v39 = vmul.f32 %v1096_v22, %v271_v62 }
  0xc5   :  { %v290_v61 = vpop.f32.mrf.mxu2  ;;  %v310_v0 = vpop.f32.mrf.mxu3 }
  0xc6   :  { %v272_v60 = vpop.f32.mrf.mxu1  ;;  %v252_v5 = vpop.f32.mrf.mxu0  ;;  %v1209_v8 = vadd.f32 %v1086_v20, %v310_v0  ;;  %v1214_v11 = vadd.f32 %v1086_v20, %v290_v61 }
  0xc7   :  { %v1196_v63 = vadd.f32 %v1086_v20, %v272_v60  ;;  %v1206_v7 = vadd.f32 %v1086_v20, %v252_v5 }
  0xc8   :  { %v341_v38 = vmul.f32 %v1096_v22, %v1214_v11  ;;  %v349_v47 = vmul.f32 %v1096_v22, %v1209_v8 }
  0xc9   :  { %v858_v3 = vpack.c.bf16 %v1196_v63, %v271_v62  ;;  %v838_v9 = vpack.c.bf16 %v1206_v7, %v1202_v4  ;;  %v326_v48 = vmul.f32 %v1096_v22, %v1206_v7  ;;  %v501_v55 = vmul.f32 %v1091_v21, %v1196_v63 }
  0xcb   :  { %570 = vadd.xlane.f32.xlu1 %v512_v34  ;;  %373 = vadd.xlane.f32.xlu2 %v330_v35  ;;  %906 = vst [vmem:[#allocation3 + $0x38] sm:$0xff] %v858_v3  }
  0xcc   :  { %538 = vadd.xlane.f32.xlu0 %v496_v36  ;;  %902 = vst [vmem:[#allocation3 + $0x18] sm:$0xff] %v838_v9  }
  0xcd   :  { %v292_v10 = vpop.f32.mrf.mxu2  ;;  %v312_v13 = vpop.f32.mrf.mxu3 }
  0xce   :  { %v1217_v12 = vadd.f32 %v1086_v20, %v292_v10  ;;  %v1220_v14 = vadd.f32 %v1086_v20, %v312_v13  ;;  %v491_v20 = vmul.f32 %v1091_v21, %v1152_v29  ;;  %v493_v10 = vmul.f32 %v1091_v21, %v1206_v7 }
  0xd0   :  { %v878_v15 = vpack.c.bf16 %v1217_v12, %v1214_v11  ;;  %v898_v16 = vpack.c.bf16 %v1220_v14, %v1209_v8  ;;  %v509_v0 = vmul.f32 %v1091_v21, %v1217_v12  ;;  %v517_v7 = vmul.f32 %v1091_v21, %v1220_v14 }
  0xd2   :  { %910 = vst [vmem:[#allocation3 + $0x58] sm:$0xff] %v878_v15  }
  0xd3   :  { %357 = vadd.xlane.f32.xlu1 %v322_v42  ;;  %524 = vadd.xlane.f32.xlu2 %v489_v43  ;;  %914 = vst [vmem:[#allocation3 + $0x78] sm:$0xff] %v898_v16   ;;  %v325_v42 = vmul.f32 %v1096_v22, %v1202_v4 }
  0xd4   :  { %387 = vadd.xlane.f32.xlu0 %v337_v44  ;;  %690 = dma.vmem_to_hbm [thread:$0]  %s683_s29, 2048, %s685_s10, [#allocation4], %s960_s6, %s960_s6, %s961_s15  }
  0xdb   :  { %540 = vadd.xlane.f32.xlu1 %v497_v49  ;;  %572 = vadd.xlane.f32.xlu2 %v513_v50  ;;  %v492_v49 = vmul.f32 %v1091_v21, %v1202_v4 }
  0xdc   :  { %405 = vadd.xlane.f32.xlu0 %v346_v51 }
  0xe3   :  { %389 = vadd.xlane.f32.xlu1 %v338_v53  ;;  %359 = vadd.xlane.f32.xlu2 %v323_v52 }
  0xe4   :  { %556 = vadd.xlane.f32.xlu0 %v505_v54  ;;  %v350_v54 = vmul.f32 %v1096_v22, %v1220_v14 }
  0xeb   :  { %407 = vadd.xlane.f32.xlu1 %v347_v56  ;;  %542 = vadd.xlane.f32.xlu2 %v498_v57  ;;  %v508_v56 = vmul.f32 %v1091_v21, %v1214_v11 }
  0xec   :  { %375 = vadd.xlane.f32.xlu0 %v331_v58 }
  0xf3   :  { %558 = vadd.xlane.f32.xlu1 %v506_v1  ;;  %391 = vadd.xlane.f32.xlu2 %v339_v2  ;;  %v342_v1 = vmul.f32 %v1096_v22, %v1217_v12  ;;  %v334_v2 = vmul.f32 %v1096_v22, %v1196_v63  ;;  %v515_v22 = vmul.f32 %v1091_v21, %v1167_v40 }
  0xf4   :  { %526 = vadd.xlane.f32.xlu0 %v490_v6  ;;  %v516_v63 = vmul.f32 %v1091_v21, %v1209_v8 }
  0xfb   :  { %377 = vadd.xlane.f32.xlu1 %v332_v17  ;;  %361 = vadd.xlane.f32.xlu2 %v324_v18 }
  0xfc   :  { %574 = vadd.xlane.f32.xlu0 %v514_v19 }
 0x103   :  { %528 = vadd.xlane.f32.xlu1 %v491_v20  ;;  %409 = vadd.xlane.f32.xlu2 %v348_v23 }
 0x104   :  { %544 = vadd.xlane.f32.xlu0 %v499_v24 }
 0x106   :  { %v535_v26 = vpop.xlane.xlu1 %534  ;;  %v368_v27 = vpop.xlane.xlu2 %367 }
 0x107   :  { %590 = vst.msk [vmem:[%s1578_s8 + $0x40] sm:$0xff] %vm449_vm1, %v535_v26  ;;  %v425_v28 = vadd.f32 %v1241_v25, %v368_v27  ;;  %v352_v29 = vpop.xlane.xlu0 %351 }
 0x108   :  { %v417_v31 = vadd.f32 %v1241_v25, %v352_v29 }
 0x109   :  { %458 = vst.msk [vmem:[%s1577_s7 + $0x40] sm:$0xff] %vm449_vm1, %v425_v28 }
 0x10a   :  { %450 = vst.msk [vmem:[%s1577_s7] sm:$0xff] %vm449_vm1, %v417_v31 }
 0x10b   :  { %546 = vadd.xlane.f32.xlu1 %v500_v30  ;;  %560 = vadd.xlane.f32.xlu2 %v507_v32 }
 0x10c   :  { %393 = vadd.xlane.f32.xlu0 %v340_v33 }
 0x10e   :  { %v384_v34 = vpop.xlane.xlu1 %383  ;;  %v519_v35 = vpop.xlane.xlu2 %518 }
 0x10f   :  { %v433_v36 = vadd.f32 %v1241_v25, %v384_v34  ;;  %582 = vst.msk [vmem:[%s1578_s8] sm:$0xff] %vm449_vm1, %v519_v35  ;;  %v400_v37 = vpop.xlane.xlu0 %399 }
 0x110   :  { %v441_v41 = vadd.f32 %v1241_v25, %v400_v37 }
 0x111   :  { %466 = vst.msk [vmem:[%s1577_s7 + $0x80] sm:$0xff] %vm449_vm1, %v433_v36 }
 0x112   :  { %474 = vst.msk [vmem:[%s1577_s7 + $0xc0] sm:$0xff] %vm449_vm1, %v441_v41 }
 0x113   :  { %395 = vadd.xlane.f32.xlu1 %v341_v38  ;;  %379 = vadd.xlane.f32.xlu2 %v333_v39 }
 0x114   :  { %363 = vadd.xlane.f32.xlu0 %v325_v42 }
 0x116   :  { %v402_v43 = vpop.xlane.xlu1 %401  ;;  %v567_v44 = vpop.xlane.xlu2 %566 }
 0x117   :  { %v442_v45 = vadd.f32 %v1241_v25, %v402_v43  ;;  %606 = vst.msk [vmem:[%s1578_s8 + $0xc0] sm:$0xff] %vm449_vm1, %v567_v44  ;;  %v551_v46 = vpop.xlane.xlu0 %550 }
 0x118   :  { %598 = vst.msk [vmem:[%s1578_s8 + $0x80] sm:$0xff] %vm449_vm1, %v551_v46 }
 0x119   :  { %475 = vst.msk [vmem:[%s1577_s7 + $0xc8] sm:$0xff] %vm449_vm1, %v442_v45 }
 0x11b   :  { %365 = vadd.xlane.f32.xlu1 %v326_v48  ;;  %530 = vadd.xlane.f32.xlu2 %v492_v49 }
 0x11c   :  { %411 = vadd.xlane.f32.xlu0 %v349_v47 }
 0x11e   :  { %v553_v50 = vpop.xlane.xlu1 %552  ;;  %v537_v51 = vpop.xlane.xlu2 %536 }
 0x11f   :  { %599 = vst.msk [vmem:[%s1578_s8 + $0x88] sm:$0xff] %vm449_vm1, %v553_v50  ;;  %v354_v52 = vpop.xlane.xlu0 %353 }
 0x120   :  { %591 = vst.msk [vmem:[%s1578_s8 + $0x48] sm:$0xff] %vm449_vm1, %v537_v51  ;;  %v418_v53 = vadd.f32 %v1241_v25, %v354_v52 }
 0x122   :  { %451 = vst.msk [vmem:[%s1577_s7 + $0x8] sm:$0xff] %vm449_vm1, %v418_v53 }
 0x123   :  { %413 = vadd.xlane.f32.xlu1 %v350_v54  ;;  %548 = vadd.xlane.f32.xlu2 %v501_v55 }
 0x124   :  { %562 = vadd.xlane.f32.xlu0 %v508_v56 }
 0x126   :  { %v356_v57 = vpop.xlane.xlu1 %355  ;;  %v386_v58 = vpop.xlane.xlu2 %385 }
 0x127   :  { %v419_v59 = vadd.f32 %v1241_v25, %v356_v57  ;;  %v434_v60 = vadd.f32 %v1241_v25, %v386_v58  ;;  %v370_v61 = vpop.xlane.xlu0 %369 }
 0x128   :  { %v426_v62 = vadd.f32 %v1241_v25, %v370_v61 }
 0x129   :  { %452 = vst.msk [vmem:[%s1577_s7 + $0x10] sm:$0xff] %vm449_vm1, %v419_v59 }
 0x12a   :  { %467 = vst.msk [vmem:[%s1577_s7 + $0x88] sm:$0xff] %vm449_vm1, %v434_v60 }
 0x12b   :  { %459 = vst.msk [vmem:[%s1577_s7 + $0x48] sm:$0xff] %vm449_vm1, %v426_v62  ;;  %564 = vadd.xlane.f32.xlu1 %v509_v0  ;;  %397 = vadd.xlane.f32.xlu2 %v342_v1 }
 0x12c   :  { %381 = vadd.xlane.f32.xlu0 %v334_v2 }
 0x12e   :  { %v372_v3 = vpop.xlane.xlu1 %371  ;;  %v404_v4 = vpop.xlane.xlu2 %403 }
 0x12f   :  { %v427_v5 = vadd.f32 %v1241_v25, %v372_v3  ;;  %v443_v6 = vadd.f32 %v1241_v25, %v404_v4  ;;  %v521_v9 = vpop.xlane.xlu0 %520 }
 0x130   :  { %583 = vst.msk [vmem:[%s1578_s8 + $0x8] sm:$0xff] %vm449_vm1, %v521_v9 }
 0x131   :  { %460 = vst.msk [vmem:[%s1577_s7 + $0x50] sm:$0xff] %vm449_vm1, %v427_v5 }
 0x132   :  { %476 = vst.msk [vmem:[%s1577_s7 + $0xd0] sm:$0xff] %vm449_vm1, %v443_v6 }
 0x133   :  { %576 = vadd.xlane.f32.xlu1 %v515_v22  ;;  %578 = vadd.xlane.f32.xlu2 %v516_v63 }
 0x134   :  { %532 = vadd.xlane.f32.xlu0 %v493_v10 }
 0x136   :  { %v523_v40 = vpop.xlane.xlu1 %522  ;;  %v555_v11 = vpop.xlane.xlu2 %554 }
 0x137   :  { %584 = vst.msk [vmem:[%s1578_s8 + $0x10] sm:$0xff] %vm449_vm1, %v523_v40  ;;  %v569_v8 = vpop.xlane.xlu0 %568 }
 0x138   :  { %600 = vst.msk [vmem:[%s1578_s8 + $0x90] sm:$0xff] %vm449_vm1, %v555_v11 }
 0x139   :  { %607 = vst.msk [vmem:[%s1578_s8 + $0xc8] sm:$0xff] %vm449_vm1, %v569_v8 }
 0x13c   :  { %580 = vadd.xlane.f32.xlu0 %v517_v7 }
 0x13e   :  { %v571_v12 = vpop.xlane.xlu1 %570  ;;  %v374_v13 = vpop.xlane.xlu2 %373 }
 0x13f   :  { %608 = vst.msk [vmem:[%s1578_s8 + $0xd0] sm:$0xff] %vm449_vm1, %v571_v12  ;;  %v428_v15 = vadd.f32 %v1241_v25, %v374_v13  ;;  %v539_v16 = vpop.xlane.xlu0 %538 }
 0x140   :  { %592 = vst.msk [vmem:[%s1578_s8 + $0x50] sm:$0xff] %vm449_vm1, %v539_v16 }
 0x141   :  { %461 = vst.msk [vmem:[%s1577_s7 + $0x58] sm:$0xff] %vm449_vm1, %v428_v15 }
 0x146   :  { %v358_v21 = vpop.xlane.xlu1 %357  ;;  %v525_v14 = vpop.xlane.xlu2 %524 }
 0x147   :  { %v420_v17 = vadd.f32 %v1241_v25, %v358_v21  ;;  %585 = vst.msk [vmem:[%s1578_s8 + $0x18] sm:$0xff] %vm449_vm1, %v525_v14  ;;  %v388_v18 = vpop.xlane.xlu0 %387 }
 0x148   :  { %v435_v19 = vadd.f32 %v1241_v25, %v388_v18 }
 0x149   :  { %453 = vst.msk [vmem:[%s1577_s7 + $0x18] sm:$0xff] %vm449_vm1, %v420_v17 }
 0x14a   :  { %468 = vst.msk [vmem:[%s1577_s7 + $0x90] sm:$0xff] %vm449_vm1, %v435_v19 }
 0x14e   :  { %v541_v20 = vpop.xlane.xlu1 %540  ;;  %v573_v23 = vpop.xlane.xlu2 %572 }
 0x14f   :  { %593 = vst.msk [vmem:[%s1578_s8 + $0x58] sm:$0xff] %vm449_vm1, %v541_v20  ;;  %v406_v24 = vpop.xlane.xlu0 %405 }
 0x150   :  { %609 = vst.msk [vmem:[%s1578_s8 + $0xd8] sm:$0xff] %vm449_vm1, %v573_v23  ;;  %v444_v26 = vadd.f32 %v1241_v25, %v406_v24 }
 0x152   :  { %477 = vst.msk [vmem:[%s1577_s7 + $0xd8] sm:$0xff] %vm449_vm1, %v444_v26 }
 0x156   :  { %v390_v27 = vpop.xlane.xlu1 %389  ;;  %v360_v28 = vpop.xlane.xlu2 %359 }
 0x157   :  { %v436_v29 = vadd.f32 %v1241_v25, %v390_v27  ;;  %v421_v30 = vadd.f32 %v1241_v25, %v360_v28  ;;  %v557_v31 = vpop.xlane.xlu0 %556 }
 0x158   :  { %601 = vst.msk [vmem:[%s1578_s8 + $0x98] sm:$0xff] %vm449_vm1, %v557_v31 }
 0x159   :  { %469 = vst.msk [vmem:[%s1577_s7 + $0x98] sm:$0xff] %vm449_vm1, %v436_v29 }
 0x15a   :  { %454 = vst.msk [vmem:[%s1577_s7 + $0x20] sm:$0xff] %vm449_vm1, %v421_v30 }
 0x15e   :  { %v408_v32 = vpop.xlane.xlu1 %407  ;;  %v543_v33 = vpop.xlane.xlu2 %542 }
 0x15f   :  { %v445_v34 = vadd.f32 %v1241_v25, %v408_v32  ;;  %594 = vst.msk [vmem:[%s1578_s8 + $0x60] sm:$0xff] %vm449_vm1, %v543_v33  ;;  %v376_v35 = vpop.xlane.xlu0 %375 }
 0x160   :  { %v429_v36 = vadd.f32 %v1241_v25, %v376_v35 }
 0x161   :  { %478 = vst.msk [vmem:[%s1577_s7 + $0xe0] sm:$0xff] %vm449_vm1, %v445_v34 }
 0x162   :  { %462 = vst.msk [vmem:[%s1577_s7 + $0x60] sm:$0xff] %vm449_vm1, %v429_v36 }
 0x166   :  { %v559_v37 = vpop.xlane.xlu1 %558  ;;  %v392_v38 = vpop.xlane.xlu2 %391 }
 0x167   :  { %602 = vst.msk [vmem:[%s1578_s8 + $0xa0] sm:$0xff] %vm449_vm1, %v559_v37  ;;  %v437_v39 = vadd.f32 %v1241_v25, %v392_v38  ;;  %v527_v41 = vpop.xlane.xlu0 %526 }
 0x168   :  { %586 = vst.msk [vmem:[%s1578_s8 + $0x20] sm:$0xff] %vm449_vm1, %v527_v41 }
 0x169   :  { %470 = vst.msk [vmem:[%s1577_s7 + $0xa0] sm:$0xff] %vm449_vm1, %v437_v39 }
 0x16e   :  { %v378_v42 = vpop.xlane.xlu1 %377  ;;  %v362_v43 = vpop.xlane.xlu2 %361 }
 0x16f   :  { %v430_v44 = vadd.f32 %v1241_v25, %v378_v42  ;;  %v422_v45 = vadd.f32 %v1241_v25, %v362_v43  ;;  %v575_v46 = vpop.xlane.xlu0 %574 }
 0x170   :  { %610 = vst.msk [vmem:[%s1578_s8 + $0xe0] sm:$0xff] %vm449_vm1, %v575_v46 }
 0x171   :  { %463 = vst.msk [vmem:[%s1577_s7 + $0x68] sm:$0xff] %vm449_vm1, %v430_v44 }
 0x172   :  { %455 = vst.msk [vmem:[%s1577_s7 + $0x28] sm:$0xff] %vm449_vm1, %v422_v45 }
 0x176   :  { %v529_v47 = vpop.xlane.xlu1 %528  ;;  %v410_v48 = vpop.xlane.xlu2 %409 }
 0x177   :  { %587 = vst.msk [vmem:[%s1578_s8 + $0x28] sm:$0xff] %vm449_vm1, %v529_v47  ;;  %v446_v49 = vadd.f32 %v1241_v25, %v410_v48  ;;  %v545_v50 = vpop.xlane.xlu0 %544 }
 0x178   :  { %595 = vst.msk [vmem:[%s1578_s8 + $0x68] sm:$0xff] %vm449_vm1, %v545_v50 }
 0x179   :  { %479 = vst.msk [vmem:[%s1577_s7 + $0xe8] sm:$0xff] %vm449_vm1, %v446_v49 }
 0x17e   :  { %v547_v51 = vpop.xlane.xlu1 %546  ;;  %v561_v52 = vpop.xlane.xlu2 %560 }
 0x17f   :  { %596 = vst.msk [vmem:[%s1578_s8 + $0x70] sm:$0xff] %vm449_vm1, %v547_v51  ;;  %v394_v53 = vpop.xlane.xlu0 %393 }
 0x180   :  { %603 = vst.msk [vmem:[%s1578_s8 + $0xa8] sm:$0xff] %vm449_vm1, %v561_v52  ;;  %v438_v54 = vadd.f32 %v1241_v25, %v394_v53 }
 0x182   :  { %471 = vst.msk [vmem:[%s1577_s7 + $0xa8] sm:$0xff] %vm449_vm1, %v438_v54 }
 0x186   :  { %v396_v55 = vpop.xlane.xlu1 %395  ;;  %v380_v56 = vpop.xlane.xlu2 %379 }
 0x187   :  { %v439_v57 = vadd.f32 %v1241_v25, %v396_v55  ;;  %v431_v58 = vadd.f32 %v1241_v25, %v380_v56  ;;  %v364_v59 = vpop.xlane.xlu0 %363 }
 0x188   :  { %v423_v60 = vadd.f32 %v1241_v25, %v364_v59 }
 0x189   :  { %472 = vst.msk [vmem:[%s1577_s7 + $0xb0] sm:$0xff] %vm449_vm1, %v439_v57 }
 0x18a   :  { %464 = vst.msk [vmem:[%s1577_s7 + $0x70] sm:$0xff] %vm449_vm1, %v431_v58 }
 0x18b   :  { %456 = vst.msk [vmem:[%s1577_s7 + $0x30] sm:$0xff] %vm449_vm1, %v423_v60 }
 0x18e   :  { %v366_v61 = vpop.xlane.xlu1 %365  ;;  %v531_v62 = vpop.xlane.xlu2 %530 }
 0x18f   :  { %v424_v0 = vadd.f32 %v1241_v25, %v366_v61  ;;  %588 = vst.msk [vmem:[%s1578_s8 + $0x30] sm:$0xff] %vm449_vm1, %v531_v62  ;;  %v412_v1 = vpop.xlane.xlu0 %411 }
 0x190   :  { %v447_v2 = vadd.f32 %v1241_v25, %v412_v1 }
 0x191   :  { %457 = vst.msk [vmem:[%s1577_s7 + $0x38] sm:$0xff] %vm449_vm1, %v424_v0 }
 0x192   :  { %480 = vst.msk [vmem:[%s1577_s7 + $0xf0] sm:$0xff] %vm449_vm1, %v447_v2 }
 0x196   :  { %v414_v3 = vpop.xlane.xlu1 %413  ;;  %v549_v4 = vpop.xlane.xlu2 %548 }
 0x197   :  { %v448_v5 = vadd.f32 %v1241_v25, %v414_v3  ;;  %597 = vst.msk [vmem:[%s1578_s8 + $0x78] sm:$0xff] %vm449_vm1, %v549_v4  ;;  %v563_v6 = vpop.xlane.xlu0 %562 }
 0x198   :  { %604 = vst.msk [vmem:[%s1578_s8 + $0xb0] sm:$0xff] %vm449_vm1, %v563_v6 }
 0x199   :  { %481 = vst.msk [vmem:[%s1577_s7 + $0xf8] sm:$0xff] %vm449_vm1, %v448_v5 }
 0x19e   :  { %v565_v9 = vpop.xlane.xlu1 %564  ;;  %v398_v22 = vpop.xlane.xlu2 %397 }
 0x19f   :  { %605 = vst.msk [vmem:[%s1578_s8 + $0xb8] sm:$0xff] %vm449_vm1, %v565_v9  ;;  %v440_v63 = vadd.f32 %v1241_v25, %v398_v22  ;;  %v382_v10 = vpop.xlane.xlu0 %381 }
 0x1a0   :  { %v432_v40 = vadd.f32 %v1241_v25, %v382_v10 }
 0x1a1   :  { %473 = vst.msk [vmem:[%s1577_s7 + $0xb8] sm:$0xff] %vm449_vm1, %v440_v63 }
 0x1a2   :  { %465 = vst.msk [vmem:[%s1577_s7 + $0x78] sm:$0xff] %vm449_vm1, %v432_v40 }
 0x1a6   :  { %v577_v11 = vpop.xlane.xlu1 %576  ;;  %v579_v8 = vpop.xlane.xlu2 %578 }
 0x1a7   :  { %611 = vst.msk [vmem:[%s1578_s8 + $0xe8] sm:$0xff] %vm449_vm1, %v577_v11  ;;  %v533_v7 = vpop.xlane.xlu0 %532 }
 0x1a8   :  { %612 = vst.msk [vmem:[%s1578_s8 + $0xf0] sm:$0xff] %vm449_vm1, %v579_v8 }
 0x1a9   :  { %589 = vst.msk [vmem:[%s1578_s8 + $0x38] sm:$0xff] %vm449_vm1, %v533_v7 }
 0x1af   :  { %v581_v25 = vpop.xlane.xlu0 %580 }
 0x1b0   :  { %613 = vst.msk [vmem:[%s1578_s8 + $0xf8] sm:$0xff] %vm449_vm1, %v581_v25 }
 0x1b1   :  { %957 = dma.done.wait [#allocation4], 2048  }
 0x1b2   :  { %958 = vsyncadd [#allocation4], 4294965248 }
 0x1b3   :  { %703 = vsyncpa [#allocation4], 1 }

</bundles_post_ra>
